<compile_context>
chip_gen: v6e
topology: v6e:2x2x1
jax: 0.10.0
libtpu: 0.0.40
codegen_flags: <defaults>
</compile_context>

<pallas_src>
import jax
import jax.numpy as jnp
from jax.experimental import pallas as pl
from jax.experimental.pallas import tpu as pltpu


def _cdiv(a, b):
    return (a + b - 1) // b


def _round_up(x, m):
    return _cdiv(x, m) * m


def _patch_matmul_kernel(p_ref, w_ref, o_ref):
    # p_ref: (tm, K) bf16 patch rows, w_ref: (K, E) bf16 resident weight,
    # o_ref: (tm, E) output. Single MXU matmul, fp32 accumulation, direct store.
    o_ref[...] = jnp.dot(
        p_ref[...], w_ref[...], preferred_element_type=jnp.float32
    ).astype(o_ref.dtype)


def _pick_tile_m(M, K, E):
    """Largest M tile that fits the VMEM budget while keeping >=2 grid points."""
    try:
        vmem_cap = pltpu.get_tpu_info().vmem_capacity_bytes
    except Exception:
        vmem_cap = 64 * 1024 * 1024  # conservative fallback (v7x-sized)
    budget = min(vmem_cap // 2, 48 * 1024 * 1024)

    w_bytes = 2 * K * E * 2  # resident bf16 weight (budget two buffers)
    # TODO(synk): add a K-tiled reduction fallback if the weight ever exceeds VMEM.
    assert w_bytes <= budget, "weight does not fit VMEM-resident; need K tiling"

    def vmem_needed(tm):
        # double-buffered bf16 patch tile + resident weight + double-buffered f32 out tile
        return w_bytes + 2 * tm * K * 2 + 2 * tm * E * 4

    tm = 8
    for cand in (2048, 1024, 512, 256, 128, 64, 32, 16, 8):
        if vmem_needed(cand) <= budget and (M >= 2 * cand or cand == 8):
            tm = cand
            break
    if M <= tm:
        # tiny problem: one tile covering all of M (sublane multiple of 8)
        tm = max(8, _round_up(M, 8))
    elif M < 2 * tm:
        # split so the "parallel" M axis has 2 points (v7x has 2 TensorCores)
        tm = max(8, _round_up(_cdiv(M, 2), 8))
    vmem_limit = int(min(vmem_cap, max(vmem_needed(tm) + (8 << 20), 32 << 20)))
    return tm, vmem_limit


def patch_embedding_forward(x, weight, patch_size):
    """x: (B, C, H, W); weight: (E, C, ph, pw) (PyTorch Conv2d layout, bias=False).

    Returns (B, num_patches, embed_dim), matching conv -> flatten(2) -> transpose(1, 2).
    """
    ph, pw = patch_size
    B, C, H, W = x.shape
    E = weight.shape[0]
    assert weight.shape == (E, C, ph, pw)
    assert H % ph == 0 and W % pw == 0
    Hp, Wp = H // ph, W // pw
    N = Hp * Wp
    K = C * ph * pw
    M = B * N
    out_dtype = x.dtype

    # ---- glue: im2col as ONE fused XLA copy (f32 read, bf16 write, no pad pass) ----
    # TODO(synk): fuse this gather into the kernel (BlockSpec / manual DMA over (b, hp)).
    patches = jnp.transpose(
        x.astype(jnp.bfloat16).reshape(B, C, Hp, ph, Wp, pw),
        (0, 2, 4, 1, 3, 5),
    ).reshape(M, K)                                             # rows=(b,hp,wp), cols=(c,p,q)

    # conv weight (E, C, ph, pw) -> (K, E): one-time tiny shuffle, bf16 operand.
    w_mat = jnp.transpose(weight.reshape(E, K).astype(jnp.bfloat16), (1, 0))

    tm, vmem_limit = _pick_tile_m(M, K, E)
    grid_m = _cdiv(M, tm)  # partial last tile handled by Pallas masking

    out = pl.pallas_call(
        _patch_matmul_kernel,
        out_shape=jax.ShapeDtypeStruct((M, E), out_dtype),
        grid_spec=pltpu.PrefetchScalarGridSpec(
            num_scalar_prefetch=0,
            grid=(grid_m,),
            in_specs=[
                pl.BlockSpec((tm, K), lambda i: (i, 0)),   # patch rows, streamed over M
                pl.BlockSpec((K, E), lambda i: (0, 0)),    # weight resident (DMA'd once)
            ],
            out_specs=pl.BlockSpec((tm, E), lambda i: (i, 0)),
        ),
        compiler_params=pltpu.CompilerParams(
            dimension_semantics=("parallel",),
            vmem_limit_bytes=vmem_limit,
        ),
        cost_estimate=pl.CostEstimate(
            flops=int(2 * M * K * E),
            bytes_accessed=int(M * K * 2 + K * E * 2
                               + M * E * jnp.dtype(out_dtype).itemsize),
            transcendentals=0,
        ),
    )(patches, w_mat)

    # (M, E) -> (B, N, E): free reshape, no slice/copy.
    return out.reshape(B, N, E)


if __name__ == "__main__":
    # Small shapes consistent with the module: B=2, C=4, H=W=16, patch=4, E=32.
    B, C, H, W = 2, 4, 16, 16
    patch_size = (4, 4)
    E = 32

    key = jax.random.PRNGKey(0)
    kx, kw = jax.random.split(key)
    x = jax.random.normal(kx, (B, C, H, W), dtype=jnp.float32)
    # Deterministic synthetic conv weight (E, C, ph, pw) -- no checkpoint load.
    weight = jax.random.normal(kw, (E, C, *patch_size), dtype=jnp.float32) * 0.02

    fwd = jax.jit(patch_embedding_forward, static_argnums=2)
    out = jax.block_until_ready(fwd(x, weight, patch_size))

    # Reference: stride==kernel conv (bias=False) with the same bf16 operand rounding
    # (intentional numerics relaxation; accumulation is fp32 in both paths).
    xr = x.astype(jnp.bfloat16).astype(jnp.float32)
    wr = weight.astype(jnp.bfloat16).astype(jnp.float32)
    ref = jax.lax.conv_general_dilated(
        xr, wr,
        window_strides=patch_size, padding="VALID",
        dimension_numbers=("NCHW", "OIHW", "NCHW"),
        precision=jax.lax.Precision.HIGHEST,
    )
    Hp, Wp = H // patch_size[0], W // patch_size[1]
    ref = jnp.transpose(ref.reshape(B, E, Hp * Wp), (0, 2, 1))  # (B, N, E)

    assert out.shape == (B, Hp * Wp, E)
    assert jnp.allclose(out, ref.astype(out.dtype), atol=1e-3, rtol=1e-3), float(
        jnp.max(jnp.abs(out - ref))
    )

    print("KERNEL_OK")
</pallas_src>

<mosaic_0001>
module attributes {stable_mosaic.version = 11 : i64} {
  func.func @_patch_matmul_kernel(%arg0: i32, %arg1: memref<16x64xbf16, #tpu.memory_space<vmem>>, %arg2: memref<64x32xbf16, #tpu.memory_space<vmem>>, %arg3: memref<16x32xf32, #tpu.memory_space<vmem>>) attributes {dimension_semantics = [#tpu.dimension_semantics<parallel>], iteration_bounds = array<i64: 2>, scalar_prefetch = 0 : i64, scratch_operands = 0 : i64, tpu.core_type = #tpu.core_type<tc>, window_params = [{transform_indices = @transform_0, window_bounds = array<i64: 16, 64>}, {pipeline_mode = #tpu.pipeline_mode<synchronous>, transform_indices = @transform_1, window_bounds = array<i64: 64, 32>}, {transform_indices = @transform_2, window_bounds = array<i64: 16, 32>}]} {
    %c0 = arith.constant 0 : index
    %c0_0 = arith.constant 0 : index
    %0 = vector.load %arg1[%c0, %c0_0] : memref<16x64xbf16, #tpu.memory_space<vmem>>, vector<16x64xbf16>
    %c0_1 = arith.constant 0 : index
    %c0_2 = arith.constant 0 : index
    %1 = vector.load %arg2[%c0_1, %c0_2] : memref<64x32xbf16, #tpu.memory_space<vmem>>, vector<64x32xbf16>
    %cst = arith.constant dense<0.000000e+00> : vector<16x32xf32>
    %2 = tpu.matmul %0, %1, %cst {dimension_numbers = #tpu.dot_dimension_numbers<[1], [0], [0], [1], [0, 0, 1, 1], [], []>} : vector<16x64xbf16>, vector<64x32xbf16>, vector<16x32xf32> -> vector<16x32xf32>
    %c0_3 = arith.constant 0 : index
    %c0_4 = arith.constant 0 : index
    %3 = vector.load %arg3[%c0_3, %c0_4] : memref<16x32xf32, #tpu.memory_space<vmem>>, vector<16x32xf32>
    tpu.vector_store %arg3[%c0_3, %c0_4], %2 {strides = array<i32>} : memref<16x32xf32, #tpu.memory_space<vmem>>, vector<16x32xf32>,
    return
  }
  func.func @transform_0(%arg0: i32) -> (i32, i32) {
    %c0_i32 = arith.constant 0 : i32
    %c0_i32_0 = arith.constant 0 : i32
    return %arg0, %c0_i32 : i32, i32
  }
  func.func @transform_1(%arg0: i32) -> (i32, i32) {
    %c0_i32 = arith.constant 0 : i32
    %c0_i32_0 = arith.constant 0 : i32
    %c0_i32_1 = arith.constant 0 : i32
    return %c0_i32, %c0_i32_0 : i32, i32
  }
  func.func @transform_2(%arg0: i32) -> (i32, i32) {
    %c0_i32 = arith.constant 0 : i32
    %c0_i32_0 = arith.constant 0 : i32
    return %arg0, %c0_i32 : i32, i32
  }
}

</mosaic_0001>

<bundles_post_ra>
// kernel: patch_embedding_forward.1
= control target key start
LH: loop header
LB: loop body
LE: loop exit
PB: predicated region body
PF: predicated region fallthrough
CT: control target
= control target key end

     0   :  { %7 = vsyncpa [#allocation3], 0  ;;  %s588_s0 = inlined_call_operand.vmem [shape: bf16[32,64], index: 0, kind: input, shape index: {}]   ;;  %s589_s1 = inlined_call_operand.vmem [shape: bf16[64,32], index: 1, kind: input, shape index: {}]   ;;  %s590_s2 = inlined_call_operand.hbm [shape: f32[32,32], index: 2, kind: output, shape index: {}]  }
   0x1   :  { %9 = vsyncpa [#allocation3 + $0x1], 0  ;;  %s475_s9 = smov 0   ;;  %s477_s10 = smov 0  }
   0x2   :  { %s479_s11 = smov 0   ;;  %s481_s12 = smov 0  }
   0x3 LB: > { %s496_s13 = sadd.s32 4294967295, %s453_s12   ;;  %s309_s14 = sadd.s32 4294967294, %s453_s12   ;;  %s453_s12 = sphi %s481_s12, %s596_s12   ;;  %s449_s11 = sphi %s479_s11, %s595_s11   ;;  %s445_s10 = sphi %s477_s10, %s594_s10   ;;  %s441_s9 = sphi %s475_s9, %s593_s9  }
   0x4   : > { %s500_s15 = sadd.s32 1, %s453_s12   ;;  %s69_s16 = sadd.s32 1, %s449_s11 }
   0x5   : > { %s66_s17 = ssub.s32 %s453_s12, %s500_s15  ;;  %p79_p0 = scmp.ne.s32.totalorder %s449_s11, %s445_s10 }
   0x6   : > { %p67_p1 = scmp.eq.s32.totalorder %s66_s17, 0  ;;  %p80_p2 = scmp.eq.s32.totalorder %s496_s13, 1 }
   0x7   : > { %p85_p3 = scmp.ne.s32.totalorder %s445_s10, %s441_s9  ;;  %p86_p4 = scmp.eq.s32.totalorder %s309_s14, 1 }
   0x8   : > { %s511_s18 = scalar_select %p67_p1, %s449_s11, %s69_s16  }
   0x9   : > { %p513_p5 = por %p80_p2, %p79_p0  ;;  %p517_p6 = por %p86_p4, %p85_p3 }
   0xa   : > { %p312_p7 = scmp.ge.s32.totalorder %s453_s12, 1  ;;  %p116_p8 = scmp.lt.s32.totalorder %s453_s12, 3 }
   0xc   : > { %p117_p9 = pnand %p312_p7, %p116_p8 }
   0xd   : > { %s314_s25 = sshll.u32 (!%p117_p9), %s496_s13, 1  ;;  %s135_s6 = sand.u32 (!%p117_p9), 1, %s445_s10  }
   0xe   : > { %120 = sbr.rel (%p117_p9) target bundleno = 248 (0xf8), region = 28  ;;  %p139_p10 = scmp.lt.s32.totalorder (!%p117_p9), %s314_s25, 3 }
   0xf   : > { %s313_s7 = sshll.u32 (!%p117_p9), %s135_s6, 4  ;;  %s327_s16 = sshll.u32 (!%p117_p9), %s496_s13, 8 }
  0x10   : > { %s137_s8 = scalar_lea.vmem (!%p117_p9), [#allocation2], %s313_s7  ;;  %s546_s22 = scalar_lea.hbm (!%p117_p9), %s590_s2, %s327_s16 }
  0x11   : > { %s247_s14 = sshll.u32 (!%p117_p9), %s137_s8, 4  ;;  %s548_s23 = scalar_lea.sflag (!%p117_p9), [#allocation3], %s135_s6  ;;  %s541_s14 = int_to_ptr.vmem [resolvable:$true] %s247_s14 }
  0x12   : > { %s393_s24 = scalar_lea.vmem (!%p117_p9), %s541_s14, 256  ;;  %s457_s13 = smov (!%p117_p9), [#allocation2]  }
  0x13   : > { %v388_v0 = vld [vmem:[%s589_s1 + $0x18] sm:$0xff]   ;;  %v455_v1 = vmov 0.0   ;;  %v389_v2 = vld [vmem:[%s589_s1 + $0x10] sm:$0xff]   ;;  %vm456_vm0 = vmmov 0   ;;  %s598_s25 = smov (!%p139_p10, %s314_s25), 3  ;;  %v390_v3 = vld [vmem:[%s589_s1 + $0x8] sm:$0xff]   ;;  %p394_p11 = scmp.ne.s32.totalorder %s541_s14, %s393_s24 }
  0x14   : > { %333 = vmatprep.subr.bf16.mxu0 %v455_v1  ;;  %341 = vmatprep.mubr.msk.bf16.mxu0 %vm456_vm0, %v455_v1  ;;  %s315_s28 = sshll.u32 %s598_s25, 2  ;;  %v391_v4 = vld [vmem:[%s589_s1] sm:$0xff]   ;;  %vm185_vm1 = vcmask 523264   ;;  %vm230_vm2 = vcmask 261120   ;;  %s397_s25 = sshll.u32 %s457_s13, 4  ;;  %s398_s25 = int_to_ptr.vmem [resolvable:$false] %s397_s25 }
  0x15   : > { %334 = vmatpush3.bf16.msra.mxu0 %v388_v0  ;;  %s142_s3 = scalar_lea.vmem %s588_s0, %s315_s28  ;;  %p395_p12 = pnand %p394_p11, %p513_p5 }
  0x16   : > { %335 = vmatprep.subr.bf16.mxu0 %v455_v1  ;;  %v392_v5 = vld [vmem:[%s142_s3] sm:$0xff]   ;;  %s399_s26 = scalar_lea.vmem %s398_s25, 512  ;;  %p400_p0 = scmp.lt.s32.totalorder %s541_s14, %s398_s25 }
  0x17   : > { %p396_p13 = pneg %p395_p12  ;;  %p401_p1 = scmp.lt.s32.totalorder %s399_s26, %s393_s24 }
  0x19   : > { %336 = vmatpush3.bf16.msra.mxu0 %v389_v2  ;;  %p402_p2 = por %p401_p1, %p400_p0 }
  0x1a   : > { %337 = vmatprep.subr.bf16.mxu0 %v455_v1 }
  0x1b   : > { %p403_p3 = pnand %p402_p2, %p396_p13 }
  0x1d   : > { %338 = vmatpush3.bf16.msra.mxu0 %v390_v3 }
  0x1e   : > { %339 = vmatprep.subr.bf16.mxu0 %v455_v1 }
  0x21   : > { %340 = vmatpush3.bf16.msra.mxu0 %v391_v4 }
  0x24   : > { %342 = vmatmul.mubr.msk.bf16.vlgmr.msra.gmra.mxu0 %vm185_vm1, %v392_v5 }
  0xe4   : > { %v223_v6 = vpop.f32.mrf.mxu0 }
  0xe5   : > { %231 = vst.msk [vmem:[%s137_s8] sm:$0xff] %vm230_vm2, %v223_v6 }
  0xe6   : > { %v343_v7 = vpop.f32.mrf.mxu0 }
  0xe8   : > { %v226_v8 = vpop.f32.mrf.mxu0 }
  0xe9   : > { %232 = vst.msk [vmem:[%s137_s8 + $0x8] sm:$0xff] %vm230_vm2, %v226_v8 }
  0xea   : > { %v344_v9 = vpop.f32.mrf.mxu0 }
  0xeb   : > { %406 = shalt.err (!%p403_p3)
}
  0xec   : > { %s407_s27 = scalar_lea.hbm %s546_s22, 256  ;;  %s411_s30 = scalar_lea.hbm %s590_s2, 512 }
  0xed   : > { %p408_p4 = scmp.ne.s32.totalorder %s546_s22, %s407_s27  ;;  %p412_p9 = scmp.lt.s32.totalorder %s546_s22, %s590_s2 }
  0xee   : > { %p413_p10 = scmp.lt.s32.totalorder %s411_s30, %s407_s27 }
  0xef   : > { %p409_p7 = pnand %p408_p4, %p513_p5 }
  0xf0   : > { %p414_p11 = por %p413_p10, %p412_p9 }
  0xf1   : > { %p410_p8 = pneg %p409_p7 }
  0xf3   : > { %p415_p12 = pnand %p414_p11, %p410_p8 }
  0xf5   : > { %418 = shalt.err (!%p415_p12)
}
  0xf6   : > { %s458_s5 = smov 128   ;;  %s459_s6 = smov 8  }
  0xf7   : > { %345 = dma.vmem_to_hbm [thread:$0]  (%p513_p5), %s541_s14, 256, %s546_s22, %s548_s23, %s458_s5, %s458_s5, %s459_s6  }
  0xf8 PF: > { %p351_p13 = scmp.ge.s32.totalorder %s453_s12, 2  ;;  %s262_s7 = sand.u32 1, %s441_s9  }
  0xf9   : > { %s263_s8 = scalar_lea.sflag [#allocation3], %s262_s7 }
  0xfa   : > { %p348_p0 = pnand %p351_p13, %p517_p6 }
  0xfc   : > { %p349_p1 = pneg %p348_p0 }
  0xfe   : > { %436 = dma.done.wait (%p349_p1), %s263_s8, 256  }
  0xff   : > { %438 = vsyncadd (%p349_p1), %s263_s8, 4294967040  ;;  %p12_p2 = scmp.ge.s32.totalorder %s500_s15, 4   ;;  %s593_s9 = smov %s445_s10 }
 0x100   : > { %s594_s10 = smov %s449_s11  ;;  %s595_s11 = smov %s511_s18 }
 0x101   : > { %s596_s12 = smov %s500_s15  ;;  %14 = sbr.rel (!%p12_p2) target bundleno = 3 (0x3), region = 63 }
 0x106   :  { %268 = vsyncpa [#allocation3], 1 }
 0x107   :  { %270 = vsyncpa [#allocation3 + $0x1], 1 }

</bundles_post_ra>
